<compile_context>
chip_gen: v6e
topology: v6e:2x2x1
jax: 0.10.0
libtpu: 0.0.40
codegen_flags: <defaults>
</compile_context>

<pallas_src>
import functools

import jax
import jax.numpy as jnp
from jax.experimental import pallas as pl
from jax.experimental.pallas import tpu as pltpu


# ----------------------------------------------------------------------------
# Fused Pallas kernel: conv-bias + noise injection + LeakyReLU + IN + AdaIN
# ----------------------------------------------------------------------------
def _fused_adain_kernel(y_ref, nz_ref, cb_ref, nw_ref, ss_ref, sb_ref, o_ref,
                        *, inv_hw, eps, alpha):
    # y_ref : (TC, HW)  raw conv output tile (channels x flattened spatial)
    # nz_ref: (1, HW)   per-batch noise row (shared across channels)
    # cb_ref: (TC, 1)   WSConv2d per-channel bias
    # nw_ref: (TC, 1)   InjectNoise per-channel weight
    # ss_ref: (TC, 1)   precomputed AdaIN style scale for this (n, channel tile)
    # sb_ref: (TC, 1)   precomputed AdaIN style bias
    y = y_ref[...].astype(jnp.float32)
    nz = nz_ref[...].astype(jnp.float32)
    cb = cb_ref[...].astype(jnp.float32)
    nw = nw_ref[...].astype(jnp.float32)
    ss = ss_ref[...].astype(jnp.float32)
    sb = sb_ref[...].astype(jnp.float32)

    # conv bias + InjectNoise + LeakyReLU(0.2)
    z = y + cb + nw * nz                    # (TC,1) broadcasts against (TC,HW)
    a = jnp.where(z > 0, z, alpha * z)

    # InstanceNorm2d (biased variance, two-pass to avoid cancellation).
    mean = jnp.sum(a, axis=-1, keepdims=True) * inv_hw
    centered = a - mean
    var = jnp.sum(centered * centered, axis=-1, keepdims=True) * inv_hw
    x_norm = centered * jax.lax.rsqrt(var + eps)

    # AdaIN modulation.
    o_ref[...] = (ss * x_norm + sb).astype(o_ref.dtype)


def _pick_channel_tile(c, hw, itemsize, target_bytes=4 << 20):
    """Largest channel tile with ~target_bytes per block; multiple of 8 or full C."""
    max_tc = max(1, target_bytes // (hw * itemsize))
    if c <= max_tc:
        return c
    tc = None
    for d in range(8, int(min(c, max_tc)) + 1, 8):
        if c % d == 0:
            tc = d
    return tc if tc is not None else c


def fused_bias_noise_leaky_adain(y, conv_bias, noise, noise_weight,
                                 style_scale, style_bias, *, eps=1e-5, alpha=0.2):
    """y: (N,C,H,W) raw conv output (no bias); conv_bias/noise_weight: (C,);
    noise: (N,1,H,W); style_scale/style_bias: (N,C) precomputed WSLinear outputs."""
    N, C, H, W = y.shape
    HW = H * W

    # Free (contiguous) reshapes -- no HBM copies, no padding round trip.
    y_flat = y.reshape(N, C, HW)
    nz_flat = noise.reshape(N, 1, HW)
    cb = conv_bias.reshape(C, 1).astype(y.dtype)
    nw = noise_weight.reshape(C, 1).astype(y.dtype)
    ss = style_scale.reshape(N, C, 1).astype(y.dtype)
    sb = style_bias.reshape(N, C, 1).astype(y.dtype)

    tc = _pick_channel_tile(C, HW, y.dtype.itemsize)
    grid = (N, C // tc)

    kernel = functools.partial(
        _fused_adain_kernel, inv_hw=1.0 / HW, eps=eps, alpha=alpha)

    out_flat = pl.pallas_call(
        kernel,
        out_shape=jax.ShapeDtypeStruct((N, C, HW), y.dtype),
        grid_spec=pltpu.PrefetchScalarGridSpec(
            num_scalar_prefetch=0,
            grid=grid,
            in_specs=[
                pl.BlockSpec((pl.Squeezed(), tc, HW), lambda n, c: (n, c, 0)),  # y
                pl.BlockSpec((pl.Squeezed(), 1, HW), lambda n, c: (n, 0, 0)),   # noise
                pl.BlockSpec((tc, 1), lambda n, c: (c, 0)),                     # conv bias
                pl.BlockSpec((tc, 1), lambda n, c: (c, 0)),                     # noise weight
                pl.BlockSpec((pl.Squeezed(), tc, 1), lambda n, c: (n, c, 0)),   # style scale
                pl.BlockSpec((pl.Squeezed(), tc, 1), lambda n, c: (n, c, 0)),   # style bias
            ],
            out_specs=pl.BlockSpec((pl.Squeezed(), tc, HW), lambda n, c: (n, c, 0)),
        ),
        compiler_params=pltpu.CompilerParams(
            dimension_semantics=("parallel", "parallel"),
            vmem_limit_bytes=48 * 1024 * 1024,   # <= v7x 64 MiB physical VMEM
        ),
    )(y_flat, nz_flat, cb, nw, ss, sb)

    return out_flat.reshape(N, C, H, W)


# ----------------------------------------------------------------------------
# XLA-side pieces of GenBlock (small / MXU-native ops, hoisted per the review)
# ----------------------------------------------------------------------------
def ws_conv2d_nobias(x, weight):
    """WSConv2d body: conv2d(x * sqrt(2/(C_in*k*k)), W), 3x3 / stride 1 / pad 1.
    The per-channel bias is added inside the fused Pallas kernel."""
    c_in, kh, kw = weight.shape[1], weight.shape[2], weight.shape[3]
    scale = (2.0 / (c_in * kh * kw)) ** 0.5
    return jax.lax.conv_general_dilated(
        x * scale, weight, window_strides=(1, 1), padding=((1, 1), (1, 1)),
        dimension_numbers=("NCHW", "OIHW", "NCHW"))


def ws_conv2d(x, weight, bias):
    """Full WSConv2d (used only by the plain-JAX reference)."""
    return ws_conv2d_nobias(x, weight) + bias[None, :, None, None]


def ws_linear(v, weight, bias):
    """WSLinear: (v * sqrt(2/in_features)) @ W^T + b."""
    scale = (2.0 / weight.shape[1]) ** 0.5
    return (v * scale) @ weight.T + bias[None, :]


def gen_block_forward(x, w, params, noise1, noise2, *, eps=1e-5):
    """GenBlock.forward: conv -> inject_noise -> leaky -> adain, twice.
    Noise tensors are explicit inputs (deterministic stand-in for torch.randn)."""
    h = ws_conv2d_nobias(x, params["conv1_w"])
    ss1 = ws_linear(w, params["ss1_w"], params["ss1_b"])
    sb1 = ws_linear(w, params["sb1_w"], params["sb1_b"])
    h = fused_bias_noise_leaky_adain(h, params["conv1_b"], noise1, params["nw1"],
                                     ss1, sb1, eps=eps)

    h = ws_conv2d_nobias(h, params["conv2_w"])
    ss2 = ws_linear(w, params["ss2_w"], params["ss2_b"])
    sb2 = ws_linear(w, params["sb2_w"], params["sb2_b"])
    h = fused_bias_noise_leaky_adain(h, params["conv2_b"], noise2, params["nw2"],
                                     ss2, sb2, eps=eps)
    return h


# ----------------------------------------------------------------------------
# Plain-JAX reference matching the PyTorch module
# ----------------------------------------------------------------------------
def gen_block_reference(x, w, params, noise1, noise2, *, eps=1e-5):
    def instance_norm(t):
        mean = jnp.mean(t, axis=(2, 3), keepdims=True)
        var = jnp.mean((t - mean) ** 2, axis=(2, 3), keepdims=True)
        return (t - mean) / jnp.sqrt(var + eps)

    def leaky(t):
        return jnp.where(t > 0, t, 0.2 * t)

    def stage(t, conv_w, conv_b, nw, noise, ss_w, ss_b, sb_w, sb_b):
        t = ws_conv2d(t, conv_w, conv_b)
        t = t + nw.reshape(1, -1, 1, 1) * noise          # InjectNoise
        t = leaky(t)
        t = instance_norm(t)
        s = ws_linear(w, ss_w, ss_b)[:, :, None, None]
        b = ws_linear(w, sb_w, sb_b)[:, :, None, None]
        return s * t + b

    h = stage(x, params["conv1_w"], params["conv1_b"], params["nw1"], noise1,
              params["ss1_w"], params["ss1_b"], params["sb1_w"], params["sb1_b"])
    h = stage(h, params["conv2_w"], params["conv2_b"], params["nw2"], noise2,
              params["ss2_w"], params["ss2_b"], params["sb2_w"], params["sb2_b"])
    return h


def init_params(key, c_in, c_out, w_dim, dtype=jnp.float32):
    ks = jax.random.split(key, 10)
    zeros_c = jnp.zeros((c_out,), dtype)
    return {
        # WSConv2d weights ~ N(0,1) (nn.init.normal_); biases made nonzero to
        # exercise the bias path.
        "conv1_w": jax.random.normal(ks[0], (c_out, c_in, 3, 3), dtype),
        "conv1_b": 0.1 * jax.random.normal(ks[1], (c_out,), dtype),
        "conv2_w": jax.random.normal(ks[2], (c_out, c_out, 3, 3), dtype),
        "conv2_b": 0.1 * jax.random.normal(ks[3], (c_out,), dtype),
        # InjectNoise weights (zero-init in PyTorch; nonzero here to test path).
        "nw1": 0.5 * jax.random.normal(ks[4], (c_out,), dtype),
        "nw2": 0.5 * jax.random.normal(ks[5], (c_out,), dtype),
        # WSLinear style projections: weight ~ N(0,1), bias zeros (as in __init__).
        "ss1_w": jax.random.normal(ks[6], (c_out, w_dim), dtype),
        "ss1_b": zeros_c,
        "sb1_w": jax.random.normal(ks[7], (c_out, w_dim), dtype),
        "sb1_b": zeros_c,
        "ss2_w": jax.random.normal(ks[8], (c_out, w_dim), dtype),
        "ss2_b": zeros_c,
        "sb2_w": jax.random.normal(ks[9], (c_out, w_dim), dtype),
        "sb2_b": zeros_c,
    }


if __name__ == "__main__":
    key = jax.random.PRNGKey(0)

    configs = [
        # (N, C_in, C_out, w_dim, H, W)
        (2, 4, 4, 8, 16, 16),   # HW = 256: lane-dense (multiple of 128)
        (2, 4, 4, 8, 8, 8),     # HW = 64 : full-extent (sub-128) lane block
    ]
    for (N, c_in, c_out, w_dim, H, W) in configs:
        key, kx, kw, kn1, kn2, kp = jax.random.split(key, 6)
        x = jax.random.normal(kx, (N, c_in, H, W), dtype=jnp.float32)
        w = jax.random.normal(kw, (N, w_dim), dtype=jnp.float32)
        noise1 = jax.random.normal(kn1, (N, 1, H, W), dtype=jnp.float32)
        noise2 = jax.random.normal(kn2, (N, 1, H, W), dtype=jnp.float32)
        params = init_params(kp, c_in, c_out, w_dim)

        out = gen_block_forward(x, w, params, noise1, noise2)
        out = jax.block_until_ready(out)
        ref = gen_block_reference(x, w, params, noise1, noise2)

        assert out.shape == (N, c_out, H, W)
        assert jnp.allclose(out, ref, atol=1e-4, rtol=1e-4), \
            f"mismatch vs reference for shape {(N, c_out, H, W)}"

    print("KERNEL_OK")
</pallas_src>

<mosaic_0001>
module attributes {stable_mosaic.version = 11 : i64} {
  func.func @_fused_adain_kernel(%arg0: i32, %arg1: i32, %arg2: memref<1x4x256xf32, #tpu.memory_space<vmem>>, %arg3: memref<1x1x256xf32, #tpu.memory_space<vmem>>, %arg4: memref<4x1xf32, #tpu.memory_space<vmem>>, %arg5: memref<4x1xf32, #tpu.memory_space<vmem>>, %arg6: memref<1x4x1xf32, #tpu.memory_space<vmem>>, %arg7: memref<1x4x1xf32, #tpu.memory_space<vmem>>, %arg8: memref<1x4x256xf32, #tpu.memory_space<vmem>>) attributes {dimension_semantics = [#tpu.dimension_semantics<parallel>, #tpu.dimension_semantics<parallel>], iteration_bounds = array<i64: 2, 1>, scalar_prefetch = 0 : i64, scratch_operands = 0 : i64, tpu.core_type = #tpu.core_type<tc>, window_params = [{transform_indices = @transform_0, window_bounds = array<i64: 1, 4, 256>}, {transform_indices = @transform_1, window_bounds = array<i64: 1, 1, 256>}, {transform_indices = @transform_2, window_bounds = array<i64: 4, 1>}, {transform_indices = @transform_3, window_bounds = array<i64: 4, 1>}, {transform_indices = @transform_4, window_bounds = array<i64: 1, 4, 1>}, {transform_indices = @transform_5, window_bounds = array<i64: 1, 4, 1>}, {transform_indices = @transform_6, window_bounds = array<i64: 1, 4, 256>}]} {
    %c0 = arith.constant 0 : index
    %c0_0 = arith.constant 0 : index
    %c0_1 = arith.constant 0 : index
    %0 = vector.load %arg2[%c0, %c0_0, %c0_1] : memref<1x4x256xf32, #tpu.memory_space<vmem>>, vector<1x4x256xf32>
    %1 = vector.shape_cast %0 : vector<1x4x256xf32> to vector<4x256xf32>
    %c0_2 = arith.constant 0 : index
    %c0_3 = arith.constant 0 : index
    %c0_4 = arith.constant 0 : index
    %2 = vector.load %arg3[%c0_2, %c0_3, %c0_4] : memref<1x1x256xf32, #tpu.memory_space<vmem>>, vector<1x1x256xf32>
    %3 = vector.shape_cast %2 : vector<1x1x256xf32> to vector<1x256xf32>
    %c0_5 = arith.constant 0 : index
    %c0_6 = arith.constant 0 : index
    %4 = vector.load %arg4[%c0_5, %c0_6] : memref<4x1xf32, #tpu.memory_space<vmem>>, vector<4x1xf32>
    %c0_7 = arith.constant 0 : index
    %c0_8 = arith.constant 0 : index
    %5 = vector.load %arg5[%c0_7, %c0_8] : memref<4x1xf32, #tpu.memory_space<vmem>>, vector<4x1xf32>
    %c0_9 = arith.constant 0 : index
    %c0_10 = arith.constant 0 : index
    %c0_11 = arith.constant 0 : index
    %6 = vector.load %arg6[%c0_9, %c0_10, %c0_11] : memref<1x4x1xf32, #tpu.memory_space<vmem>>, vector<1x4x1xf32>
    %7 = vector.shape_cast %6 : vector<1x4x1xf32> to vector<4x1xf32>
    %c0_12 = arith.constant 0 : index
    %c0_13 = arith.constant 0 : index
    %c0_14 = arith.constant 0 : index
    %8 = vector.load %arg7[%c0_12, %c0_13, %c0_14] : memref<1x4x1xf32, #tpu.memory_space<vmem>>, vector<1x4x1xf32>
    %9 = vector.shape_cast %8 : vector<1x4x1xf32> to vector<4x1xf32>
    %10 = vector.broadcast %4 : vector<4x1xf32> to vector<4x256xf32>
    %11 = arith.addf %1, %10 : vector<4x256xf32>
    %12 = vector.broadcast %5 : vector<4x1xf32> to vector<4x256xf32>
    %13 = vector.broadcast %3 : vector<1x256xf32> to vector<4x256xf32>
    %14 = arith.mulf %12, %13 : vector<4x256xf32>
    %15 = arith.addf %11, %14 : vector<4x256xf32>
    %cst = arith.constant 0.000000e+00 : f32
    %16 = vector.broadcast %cst : f32 to vector<4x256xf32>
    %17 = arith.cmpf ogt, %15, %16 : vector<4x256xf32>
    %cst_15 = arith.constant 2.000000e-01 : f32
    %18 = vector.broadcast %cst_15 : f32 to vector<4x256xf32>
    %19 = arith.mulf %18, %15 : vector<4x256xf32>
    %20 = arith.select %17, %15, %19 : vector<4x256xi1>, vector<4x256xf32>
    %cst_16 = arith.constant dense<0.000000e+00> : vector<4xf32>
    %21 = vector.multi_reduction <add>, %20, %cst_16 [1] : vector<4x256xf32> to vector<4xf32>
    %22 = vector.shape_cast %21 : vector<4xf32> to vector<4x1xf32>
    %cst_17 = arith.constant 3.906250e-03 : f32
    %23 = vector.broadcast %cst_17 : f32 to vector<4x1xf32>
    %24 = arith.mulf %22, %23 : vector<4x1xf32>
    %25 = vector.broadcast %24 : vector<4x1xf32> to vector<4x256xf32>
    %26 = arith.subf %20, %25 : vector<4x256xf32>
    %27 = arith.mulf %26, %26 : vector<4x256xf32>
    %cst_18 = arith.constant dense<0.000000e+00> : vector<4xf32>
    %28 = vector.multi_reduction <add>, %27, %cst_18 [1] : vector<4x256xf32> to vector<4xf32>
    %29 = vector.shape_cast %28 : vector<4xf32> to vector<4x1xf32>
    %cst_19 = arith.constant 3.906250e-03 : f32
    %30 = vector.broadcast %cst_19 : f32 to vector<4x1xf32>
    %31 = arith.mulf %29, %30 : vector<4x1xf32>
    %cst_20 = arith.constant 9.99999974E-6 : f32
    %32 = vector.broadcast %cst_20 : f32 to vector<4x1xf32>
    %33 = arith.addf %31, %32 : vector<4x1xf32>
    %34 = math.rsqrt %33 : vector<4x1xf32>
    %35 = vector.broadcast %34 : vector<4x1xf32> to vector<4x256xf32>
    %36 = arith.mulf %26, %35 : vector<4x256xf32>
    %37 = vector.broadcast %7 : vector<4x1xf32> to vector<4x256xf32>
    %38 = arith.mulf %37, %36 : vector<4x256xf32>
    %39 = vector.broadcast %9 : vector<4x1xf32> to vector<4x256xf32>
    %40 = arith.addf %38, %39 : vector<4x256xf32>
    %c0_21 = arith.constant 0 : index
    %c0_22 = arith.constant 0 : index
    %c0_23 = arith.constant 0 : index
    %41 = vector.load %arg8[%c0_21, %c0_22, %c0_23] : memref<1x4x256xf32, #tpu.memory_space<vmem>>, vector<1x4x256xf32>
    %42 = vector.shape_cast %41 : vector<1x4x256xf32> to vector<4x256xf32>
    %43 = vector.shape_cast %40 : vector<4x256xf32> to vector<1x4x256xf32>
    tpu.vector_store %arg8[%c0_21, %c0_22, %c0_23], %43 {strides = array<i32>} : memref<1x4x256xf32, #tpu.memory_space<vmem>>, vector<1x4x256xf32>,
    return
  }
  func.func @transform_0(%arg0: i32, %arg1: i32) -> (i32, i32, i32) {
    %c0_i32 = arith.constant 0 : i32
    %c0_i32_0 = arith.constant 0 : i32
    return %arg0, %arg1, %c0_i32 : i32, i32, i32
  }
  func.func @transform_1(%arg0: i32, %arg1: i32) -> (i32, i32, i32) {
    %c0_i32 = arith.constant 0 : i32
    %c0_i32_0 = arith.constant 0 : i32
    %c0_i32_1 = arith.constant 0 : i32
    return %arg0, %c0_i32, %c0_i32_0 : i32, i32, i32
  }
  func.func @transform_2(%arg0: i32, %arg1: i32) -> (i32, i32) {
    %c0_i32 = arith.constant 0 : i32
    %c0_i32_0 = arith.constant 0 : i32
    return %arg1, %c0_i32 : i32, i32
  }
  func.func @transform_3(%arg0: i32, %arg1: i32) -> (i32, i32) {
    %c0_i32 = arith.constant 0 : i32
    %c0_i32_0 = arith.constant 0 : i32
    return %arg1, %c0_i32 : i32, i32
  }
  func.func @transform_4(%arg0: i32, %arg1: i32) -> (i32, i32, i32) {
    %c0_i32 = arith.constant 0 : i32
    %c0_i32_0 = arith.constant 0 : i32
    return %arg0, %arg1, %c0_i32 : i32, i32, i32
  }
  func.func @transform_5(%arg0: i32, %arg1: i32) -> (i32, i32, i32) {
    %c0_i32 = arith.constant 0 : i32
    %c0_i32_0 = arith.constant 0 : i32
    return %arg0, %arg1, %c0_i32 : i32, i32, i32
  }
  func.func @transform_6(%arg0: i32, %arg1: i32) -> (i32, i32, i32) {
    %c0_i32 = arith.constant 0 : i32
    %c0_i32_0 = arith.constant 0 : i32
    return %arg0, %arg1, %c0_i32 : i32, i32, i32
  }
}

</mosaic_0001>

<bundles_post_ra>
// kernel: tpu_custom_call.1
= control target key start
LH: loop header
LB: loop body
LE: loop exit
PB: predicated region body
PF: predicated region fallthrough
CT: control target
= control target key end

     0   :  { %11 = vsyncpa [#allocation3], 0  ;;  %s982_s0 = inlined_call_operand.vmem [shape: f32[2,4,256], index: 0, kind: input, shape index: {}]   ;;  %s983_s1 = inlined_call_operand.vmem [shape: f32[2,1,256], index: 1, kind: input, shape index: {}]   ;;  %s984_s2 = inlined_call_operand.vmem [shape: f32[4,1], index: 2, kind: input, shape index: {}]   ;;  %s985_s3 = inlined_call_operand.vmem [shape: f32[4,1], index: 3, kind: input, shape index: {}]   ;;  %s986_s4 = inlined_call_operand.vmem [shape: f32[2,4,1], index: 4, kind: input, shape index: {}]   ;;  %s987_s5 = inlined_call_operand.vmem [shape: f32[2,4,1], index: 5, kind: input, shape index: {}]   ;;  %s988_s6 = inlined_call_operand.hbm [shape: f32[2,4,256], index: 6, kind: output, shape index: {}]  }
   0x1   :  { %13 = vsyncpa [#allocation3 + $0x1], 0  ;;  %s859_s21 = smov 0   ;;  %s861_s22 = smov 0  }
   0x2   :  { %s863_s23 = smov 0   ;;  %s865_s24 = smov 0  }
   0x3   :  { %s867_s25 = smov 0   ;;  %s869_s26 = smov 0  }
   0x4 LB: > { %s662_s27 = sadd.s32 4294967295, %s819_s26   ;;  %s663_s28 = sadd.s32 4294967294, %s819_s26   ;;  %s819_s26 = sphi %s869_s26, %s19_s26   ;;  %s815_s25 = sphi %s867_s25, %s995_s25   ;;  %s811_s24 = sphi %s865_s24, %s994_s24   ;;  %s807_s23 = sphi %s863_s23, %s993_s23   ;;  %s803_s22 = sphi %s861_s22, %s992_s22   ;;  %s799_s21 = sphi %s859_s21, %s991_s21  }
   0x5   : > { %s31_s29 = sadd.s32 1, %s815_s25  ;;  %s202_s30 = sadd.s32 1, %s807_s23 }
   0x6   : > { %p33_p0 = scmp.ge.s32.totalorder %s31_s29, 2  ;;  %p212_p1 = scmp.ne.s32.totalorder %s807_s23, %s803_s22 }
   0x7   : > { %p213_p2 = scmp.eq.s32.totalorder %s662_s27, 1  ;;  %p218_p3 = scmp.ne.s32.totalorder %s803_s22, %s799_s21 }
   0x8   : > { %s997_s29 = smov (%p33_p0, %s31_s29), 0  ;;  %p219_p5 = scmp.eq.s32.totalorder %s663_s28, 1 }
   0x9   : > { %p899_p4 = por %p213_p2, %p212_p1  ;;  %s197_s8 = ssub.s32 %s815_s25, %s997_s29 }
   0xa   : > { %p668_p6 = scmp.ge.s32.totalorder %s819_s26, 1  ;;  %p200_p7 = scmp.eq.s32.totalorder %s197_s8, 0 }
   0xb   : > { %p906_p8 = por %p219_p5, %p218_p3  ;;  %p290_p9 = scmp.lt.s32.totalorder %s819_s26, 3 }
   0xc   : > { %s912_s10 = scalar_select %p200_p7, %s807_s23, %s202_s30  }
   0xd   : > { %p291_p10 = pnand %p668_p6, %p290_p9 }
   0xe   : > { %p350_p11 = scmp.lt.s32.totalorder (!%p291_p10), %s811_s24, 1 }
   0xf   : > { %294 = sbr.rel (%p291_p10) target bundleno = 496 (0x1f0), region = 44 }
  0x14   : > { %v387_v0 = vld [vmem:[%s984_s2] sm:$0xf]  ;;  %v821_v1 = vmov 0   ;;  %s919_s13 = scalar_select %p350_p11, %s811_s24, 1  ;;  %v822_v4 = vmov 839922192   ;;  %v398_v6 = vlaneseq }
  0x15   : > { %739 = vset.pattern.permute.xlu0 %v821_v1  ;;  %740 = vset.pattern.permute.xlu1 %v821_v1  ;;  %v388_v2 = vld [vmem:[%s985_s3] sm:$0xf]  ;;  %v396_v5 = vunpack.c.l.s4 %v822_v4  ;;  %vm433_vm1 = vcmask 1043456  }
  0x16   : > { %393 = vperm.xlu0 %739, %v387_v0   ;;  %s673_s16 = sshll.u32 %s919_s13, 2  ;;  %s672_s20 = sshll.u32 %s919_s13, 1  ;;  %v399_v8 = vshrl.u32 %v398_v6, 7 }
  0x17   : > { %s377_s19 = scalar_lea.vmem %s986_s4, %s673_s16  ;;  %v397_v7 = vunpack.c.0.s8 %v396_v5  ;;  %s362_s30 = scalar_lea.vmem %s983_s1, %s672_s20 }
  0x18   : > { %v389_v3 = vld [vmem:[%s377_s19] sm:$0xf]  ;;  %v412_v9 = vsub.s32 0, %v399_v8  ;;  %v416_v10 = vsub.s32 1, %v399_v8  ;;  %s680_s8 = sshll.u32 %s919_s13, 3  ;;  %s384_s18 = scalar_lea.vmem %s987_s5, %s673_s16 }
  0x19   : > { %v386_v11 = vld [vmem:[%s362_s30] sm:$0x3]  ;;  %v400_v12 = vsub.s32 %v397_v7, %v399_v8  ;;  %s358_s14 = scalar_lea.vmem %s982_s0, %s680_s8  ;;  %s347_s19 = sand.u32 1, %s803_s22  }
  0x1a   : > { %406 = vperm.xlu0 %739, %v388_v2   ;;  %v413_v14 = vrot.slane %v386_v11, %v412_v9  ;;  %v417_v15 = vrot.slane %v386_v11, %v416_v10  ;;  %v385_v17 = vld [vmem:[%s358_s14] sm:$0xff]  ;;  %s669_s20 = sshll.u32 %s347_s19, 3  ;;  %s681_s13 = sshll.u32 %s811_s24, 7 }
  0x1b   : > { %v390_v39 = vld [vmem:[%s384_s18] sm:$0xf]  ;;  %s349_s16 = scalar_lea.vmem [#allocation2], %s669_s20  ;;  %s509_s8 = scalar_lea.hbm %s988_s6, %s681_s13 }
  0x1c   : > { %s511_s27 = sshll.u32 %s349_s16, 4  ;;  %s495_s11 = scalar_lea.sflag [#allocation3], %s347_s19  ;;  %s512_s27 = int_to_ptr.vmem [resolvable:$true] %s511_s27 }
  0x1d   : > { %s743_s12 = scalar_lea.vmem %s512_s27, 128  ;;  %s823_s14 = smov [#allocation2]  }
  0x1e   : > { %474 = vperm.xlu0 %739, %v389_v3   ;;  %p744_p12 = scmp.ne.s32.totalorder %s512_s27, %s743_s12  ;;  %s747_s15 = sshll.u32 %s823_s14, 4  ;;  %s748_s15 = int_to_ptr.vmem [resolvable:$false] %s747_s15 }
  0x1f   : > { %s749_s24 = scalar_lea.vmem %s748_s15, 256  ;;  %p750_p1 = scmp.lt.s32.totalorder %s512_s27, %s748_s15 }
  0x20   : > { %p745_p13 = pnand %p744_p12, %p899_p4  ;;  %p751_p2 = scmp.lt.s32.totalorder %s749_s24, %s743_s12 }
  0x22   : > { %p746_p0 = pneg %p745_p13  ;;  %p752_p3 = por %p751_p2, %p750_p1 }
  0x24   : > { %p753_p5 = pnand %p752_p3, %p746_p0 }
  0x91   : > { %v394_v13 = vpop.permute.xlu0 %393 }
  0x92   : > { %v401_v16 = vrot.slane %v394_v13, %v400_v12 }
  0x94   : > { %v403_v21 = vadd.f32 %v401_v16, %v385_v17 }
  0x95   : > { %v407_v18 = vpop.permute.xlu0 %406 }
  0x96   : > { %v420_v19 = vmul.f32 %v413_v14, %v407_v18  ;;  %v421_v20 = vmul.f32 %v417_v15, %v407_v18 }
  0x98   : > { %v424_v22 = vcombine.low %v420_v19, %v421_v20 }
  0x99   : > { %v475_v46 = vpop.permute.xlu0 %474 }
  0x9a   : > { %v426_v23 = vadd.f32 %v424_v22, %v403_v21 }
  0x9c   : > { %vm427_vm0 = vcmp.gt.f32.partialorder %v426_v23, 0.0  ;;  %v428_v24 = vmul.f32 0.2, %v426_v23 }
  0x9e   : > { %v429_v25 = vsel %vm427_vm0, %v426_v23, %v428_v24 }
  0x9f   : > { %v431_v26 = vcombine.high %v429_v25, %v429_v25  ;;  %v434_v27 = vsel %vm433_vm1, %v429_v25, 0.0 }
  0xa1   : > { %v435_v28 = vsel %vm433_vm1, %v431_v26, 0.0 }
  0xa2   : > { %v436_v29 = vadd.f32 %v435_v28, %v434_v27 }
  0xa4   : > { %437 = vadd.xlane.f32.xlu1 %v436_v29 }
 0x12d   : > { %v438_v30 = vpop.xlane.xlu1 %437 }
 0x12e   : > { %v439_v31 = vmul.f32 0.00390625, %v438_v30 }
 0x130   : > { %v447_v32 = vrot.slane %v439_v31, %v400_v12 }
 0x132   : > { %v449_v33 = vsub.f32 %v429_v25, %v447_v32 }
 0x134   : > { %v450_v34 = vmul.f32 %v449_v33, %v449_v33 }
 0x136   : > { %v452_v35 = vcombine.high %v450_v34, %v450_v34  ;;  %v454_v36 = vsel %vm433_vm1, %v450_v34, 0.0 }
 0x138   : > { %v455_v37 = vsel %vm433_vm1, %v452_v35, 0.0 }
 0x139   : > { %v456_v38 = vadd.f32 %v455_v37, %v454_v36 }
 0x13b   : > { %457 = vadd.xlane.f32.xlu1 %v456_v38 }
 0x14c   : > { %484 = vperm.xlu1 %740, %v390_v39  }
 0x1c4   : > { %v458_v40 = vpop.xlane.xlu1 %457 }
 0x1c5   : > { %v459_v41 = vmul.f32 0.00390625, %v458_v40 }
 0x1c7   : > { %v460_v42 = vadd.f32 1e-05, %v459_v41 }
 0x1c8   : > { %v485_v49 = vpop.permute.xlu1 %484 }
 0x1c9   : > { %741 = vrsqrt.f32 %v460_v42 }
 0x1d6   : > { %v742_v43 = vpop.eup %741 }
 0x1d7   : > { %v469_v44 = vrot.slane %v742_v43, %v400_v12 }
 0x1d9   : > { %v471_v45 = vmul.f32 %v469_v44, %v449_v33 }
 0x1db   : > { %v478_v47 = vcombine.high %v471_v45, %v471_v45  ;;  %v480_v48 = vmul.f32 %v475_v46, %v471_v45 }
 0x1dd   : > { %v481_v50 = vmul.f32 %v478_v47, %v475_v46  ;;  %v487_v51 = vadd.f32 %v485_v49, %v480_v48 }
 0x1df   : > { %v488_v52 = vadd.f32 %v485_v49, %v481_v50 }
 0x1e1   : > { %v491_v53 = vcombine.low %v487_v51, %v488_v52 }
 0x1e3   : > { %493 = vst [vmem:[%s349_s16] sm:$0xff] %v491_v53 }
 0x1e4   : > { %756 = shalt.err (!%p753_p5)
}
 0x1e5   : > { %s757_s17 = scalar_lea.hbm %s509_s8, 128  ;;  %s761_s20 = scalar_lea.hbm %s988_s6, 256 }
 0x1e6   : > { %p758_p6 = scmp.ne.s32.totalorder %s509_s8, %s757_s17  ;;  %p762_p10 = scmp.lt.s32.totalorder %s509_s8, %s988_s6 }
 0x1e7   : > { %p763_p11 = scmp.lt.s32.totalorder %s761_s20, %s757_s17 }
 0x1e8   : > { %p759_p7 = pnand %p758_p6, %p899_p4 }
 0x1e9   : > { %p764_p12 = por %p763_p11, %p762_p10 }
 0x1ea   : > { %p760_p9 = pneg %p759_p7 }
 0x1ec   : > { %p765_p13 = pnand %p764_p12, %p760_p9 }
 0x1ee   : > { %768 = shalt.err (!%p765_p13)
}
 0x1ef   : > { %682 = dma.vmem_to_hbm [thread:$0]  (%p899_p4), %s512_s27, 128, %s509_s8, %s495_s11  }
 0x1f0 PF: > { %p688_p0 = scmp.ge.s32.totalorder %s819_s26, 2  ;;  %s523_s28 = sand.u32 1, %s799_s21  }
 0x1f1   : > { %s524_s30 = scalar_lea.sflag [#allocation3], %s523_s28 }
 0x1f2   : > { %p685_p1 = pnand %p688_p0, %p906_p8 }
 0x1f4   : > { %p686_p2 = pneg %p685_p1 }
 0x1f6   : > { %794 = dma.done.wait (%p686_p2), %s524_s30, 128  }
 0x1f7   : > { %796 = vsyncadd (%p686_p2), %s524_s30, 4294967168  ;;  %s19_s26 = sadd.s32 1, %s819_s26   ;;  %s991_s21 = smov %s803_s22 }
 0x1f8   : > { %p16_p3 = scmp.ge.s32.totalorder %s19_s26, 4   ;;  %s992_s22 = smov %s807_s23 }
 0x1f9   : > { %s993_s23 = smov %s912_s10  ;;  %s994_s24 = smov %s815_s25 }
 0x1fa   : > { %s995_s25 = smov %s997_s29  ;;  %18 = sbr.rel (!%p16_p3) target bundleno = 4 (0x4), region = 94 }
 0x1ff   :  { %529 = vsyncpa [#allocation3], 1 }
 0x200   :  { %531 = vsyncpa [#allocation3 + $0x1], 1 }

</bundles_post_ra>
